<compile_context>
chip_gen: v7x
topology: tpu7x:2x2x1
jax: 0.10.0
libtpu: 0.0.40
codegen_flags: <defaults>
</compile_context>

<pallas_src>
import functools

import jax
import jax.numpy as jnp
from jax import lax
from jax.experimental import pallas as pl
from jax.experimental.pallas import tpu as pltpu


# ------------------------------ small helpers -------------------------------

def _round_up(n, m=128):
    return ((n + m - 1) // m) * m


def _pad_axis(a, axis, target):
    pad = target - a.shape[axis]
    if pad == 0:
        return a
    widths = [(0, 0)] * a.ndim
    widths[axis] = (0, pad)
    return jnp.pad(a, widths)


def fold_bn(gamma, beta, mean, var, eps=1e-5):
    scale = gamma / jnp.sqrt(var + eps)
    bias = beta - mean * scale
    return scale, bias


# ------------------------------ fused kernel --------------------------------

def _bottleneck_kernel(xp_ref, w1_ref, b1_ref, w2_ref, b2_ref, w3_ref, wp_ref,
                       b3_ref, o_ref, *, Ho, Wo):
    """One image per grid step.

    xp_ref : (1, 4*Ho*Wo, Cin) bf16   parity planes of x; row = plane*Ho*Wo + i*Wo + j,
                                      plane = 2*(row parity) + (col parity);
                                      plane 0 == x[::2, ::2] (projection input).
    w1_ref : (Cin, neck_p) bf16       conv1 weight * BN1 scale
    b1_ref : (1, neck_p) f32          BN1 bias (zero in padded lanes)
    w2_ref : (3, 3*neck_p, neck_p)    conv2 weight * BN2 scale; w2_ref[kh] has the three
                                      kw taps stacked along K in order [kw=0, kw=1, kw=2]
    b2_ref : (1, neck_p) f32          BN2 bias
    w3_ref : (neck_p, Cout) bf16      conv3 weight * BN3 scale
    wp_ref : (Cin, Cout) bf16         projection weight * BNp scale
    b3_ref : (1, Cout) f32            BN3 bias + BNp bias
    o_ref  : (1, Ho*Wo, Cout) bf16
    """
    HoWo = Ho * Wo
    neck_p = w1_ref.shape[1]
    bf16 = jnp.bfloat16

    # --- conv1 (1x1) + BN + ReLU over all H*W pixels (all 4 parity planes) ----------
    x_all = xp_ref[0]                                              # (4*HoWo, Cin) bf16
    h1 = jnp.dot(x_all, w1_ref[...], preferred_element_type=jnp.float32)
    h1 = jnp.maximum(h1 + b1_ref[...], 0.0)                        # (4*HoWo, neck_p) f32

    # Parity planes of h1 (flat (HoWo, neck_p), row m = oh*Wo + ow).
    P0 = h1[0 * HoWo:1 * HoWo]        # even row, even col
    P1 = h1[1 * HoWo:2 * HoWo]        # even row, odd  col
    P2 = h1[2 * HoWo:3 * HoWo]        # odd  row, even col
    P3 = h1[3 * HoWo:4 * HoWo]        # odd  row, odd  col

    # Edge masks (zero padding of the 3x3/pad-1 conv: only top row / left col matter).
    idx = lax.broadcasted_iota(jnp.int32, (HoWo, neck_p), 0)
    col_ok = (idx % Wo) != 0          # ow >= 1
    row_ok = idx >= Wo                # oh >= 1

    # kw = 0 taps need the odd-col plane shifted right by one column (roll by 1 flat row).
    P1s = jnp.where(col_ok, pltpu.roll(P1, shift=1, axis=0), 0.0)
    P3s = jnp.where(col_ok, pltpu.roll(P3, shift=1, axis=0), 0.0)

    # --- conv2: 3x3 stride-2 pad-1 + BN + ReLU as 3 fused-K MXU matmuls --------------
    # Operand per kh group, K blocks ordered [kw=0, kw=1, kw=2]:
    #   kh=1 (even rows)            : [P1s | P0 | P1]
    #   kh=2 (odd rows, offset 0)   : [P3s | P2 | P3]
    #   kh=0 (odd rows, offset -1)  : same operand as kh=2, result row-shifted down by 1.
    A1 = jnp.concatenate([P1s.astype(bf16), P0.astype(bf16), P1.astype(bf16)], axis=-1)
    A2 = jnp.concatenate([P3s.astype(bf16), P2.astype(bf16), P3.astype(bf16)], axis=-1)

    r1 = jnp.dot(A1, w2_ref[1], preferred_element_type=jnp.float32)
    r2 = jnp.dot(A2, w2_ref[2], preferred_element_type=jnp.float32)
    r0 = jnp.dot(A2, w2_ref[0], preferred_element_type=jnp.float32)
    acc = r1 + r2 + jnp.where(row_ok, pltpu.roll(r0, shift=Wo, axis=0), 0.0)
    h2 = jnp.maximum(acc + b2_ref[...], 0.0).astype(bf16)          # (HoWo, neck_p)

    # --- conv3 (1x1)+BN + projection (1x1 stride-2)+BN + residual add ---------------
    xs = x_all[0:HoWo, :]             # plane 0 = x[b, ::2, ::2, :]  (bf16)
    y = (jnp.dot(h2, w3_ref[...], preferred_element_type=jnp.float32)
         + jnp.dot(xs, wp_ref[...], preferred_element_type=jnp.float32)
         + b3_ref[...])
    o_ref[0] = y.astype(o_ref.dtype)


# ------------------------------ parameters ----------------------------------

def init_params(key, in_ch, out_ch, neck_reduction=4):
    neck = int(out_ch / neck_reduction)
    keys = jax.random.split(key, 8)

    def conv_w(k, kh, kw, cin, cout):  # HWIO
        fan_in = cin * kh * kw
        bound = 1.0 / (fan_in ** 0.5)
        return jax.random.uniform(k, (kh, kw, cin, cout), jnp.float32, -bound, bound)

    def bn(k, c):
        k1, k2, k3, k4 = jax.random.split(k, 4)
        gamma = jax.random.uniform(k1, (c,), jnp.float32, 0.5, 1.5)
        beta = jax.random.uniform(k2, (c,), jnp.float32, -0.5, 0.5)
        mean = jax.random.uniform(k3, (c,), jnp.float32, -0.5, 0.5)
        var = jax.random.uniform(k4, (c,), jnp.float32, 0.5, 1.5)
        return fold_bn(gamma, beta, mean, var)

    params = dict(
        w1=conv_w(keys[0], 1, 1, in_ch, neck),   sb1=bn(keys[1], neck),
        w2=conv_w(keys[2], 3, 3, neck, neck),    sb2=bn(keys[3], neck),
        w3=conv_w(keys[4], 1, 1, neck, out_ch),  sb3=bn(keys[5], out_ch),
        wp=conv_w(keys[6], 1, 1, in_ch, out_ch), sbp=bn(keys[7], out_ch),
    )
    return params, neck


# ------------------------------ forward pass ---------------------------------

@functools.partial(jax.jit, static_argnums=(2,))
def bottleneck_forward(x_nchw, params, neck):
    x = jnp.transpose(x_nchw, (0, 2, 3, 1)).astype(jnp.float32)    # NCHW -> NHWC
    B, H, W, Cin = x.shape
    assert H % 2 == 0 and W % 2 == 0, "stride-2/pad-1 path assumes even H, W"
    Ho, Wo = H // 2, W // 2
    HoWo = Ho * Wo
    Cout = params["w3"].shape[-1]
    neck_p = _round_up(neck, 128)      # internal only; Cin/Cout stay unpadded in HBM

    s1, b1 = params["sb1"]
    s2, b2 = params["sb2"]
    s3, b3 = params["sb3"]
    sp, bp = params["sbp"]

    # Fold BN scales into conv weights (padded neck lanes/rows are zero).
    w1f = _pad_axis(params["w1"].reshape(Cin, neck) * s1[None, :], 1, neck_p)
    w1f = w1f.astype(jnp.bfloat16)                                  # (Cin, neck_p)

    w2f = _pad_axis(_pad_axis(params["w2"] * s2, 2, neck_p), 3, neck_p)   # (3,3,neck_p,neck_p)
    w2g = w2f.reshape(3, 3 * neck_p, neck_p).astype(jnp.bfloat16)   # kw stacked along K

    w3f = _pad_axis(params["w3"].reshape(neck, Cout) * s3[None, :], 0, neck_p)
    w3f = w3f.astype(jnp.bfloat16)                                  # (neck_p, Cout)
    wpf = (params["wp"].reshape(Cin, Cout) * sp[None, :]).astype(jnp.bfloat16)

    b1p = _pad_axis(b1, 0, neck_p).reshape(1, neck_p).astype(jnp.float32)
    b2p = _pad_axis(b2, 0, neck_p).reshape(1, neck_p).astype(jnp.float32)
    b3p = (b3 + bp).reshape(1, Cout).astype(jnp.float32)

    # Parity split (one XLA layout pass over the UNPADDED tensor):
    # xp[b, 2*p + q, i*Wo + j, c] = x[b, 2*i + p, 2*j + q, c]
    xp = x.reshape(B, Ho, 2, Wo, 2, Cin).transpose(0, 2, 4, 1, 3, 5)
    xp = xp.reshape(B, 4 * HoWo, Cin).astype(jnp.bfloat16)

    out = pl.pallas_call(
        functools.partial(_bottleneck_kernel, Ho=Ho, Wo=Wo),
        out_shape=jax.ShapeDtypeStruct((B, HoWo, Cout), jnp.bfloat16),
        grid_spec=pltpu.PrefetchScalarGridSpec(
            num_scalar_prefetch=0,
            grid=(B,),
            in_specs=[
                pl.BlockSpec((1, 4 * HoWo, Cin), lambda b: (b, 0, 0)),
                pl.BlockSpec((Cin, neck_p), lambda b: (0, 0)),
                pl.BlockSpec((1, neck_p), lambda b: (0, 0)),
                pl.BlockSpec((3, 3 * neck_p, neck_p), lambda b: (0, 0, 0)),
                pl.BlockSpec((1, neck_p), lambda b: (0, 0)),
                pl.BlockSpec((neck_p, Cout), lambda b: (0, 0)),
                pl.BlockSpec((Cin, Cout), lambda b: (0, 0)),
                pl.BlockSpec((1, Cout), lambda b: (0, 0)),
            ],
            out_specs=pl.BlockSpec((1, HoWo, Cout), lambda b: (b, 0, 0)),
        ),
        compiler_params=pltpu.CompilerParams(
            dimension_semantics=("parallel",),
            vmem_limit_bytes=32 * 1024 * 1024,   # v5e scoped default is only 16 MiB
        ),
    )(xp, w1f, b1p, w2g, b2p, w3f, wpf, b3p)

    out = out.reshape(B, Ho, Wo, Cout)
    return jnp.transpose(out, (0, 3, 1, 2))        # NHWC -> NCHW (bf16)


# -------------------- pure-JAX reference (mirrors bf16 numerics) -------------

def reference_forward(x_nchw, params, neck):
    x = jnp.transpose(x_nchw, (0, 2, 3, 1)).astype(jnp.float32)
    dn = ("NHWC", "HWIO", "NHWC")
    s1, b1 = params["sb1"]
    s2, b2 = params["sb2"]
    s3, b3 = params["sb3"]
    sp, bp = params["sbp"]

    def conv(v, w, stride, pad):
        return lax.conv_general_dilated(
            v.astype(jnp.bfloat16), w.astype(jnp.bfloat16),
            (stride, stride), pad, dimension_numbers=dn,
            preferred_element_type=jnp.float32)

    w1f, w2f, w3f, wpf = (params["w1"] * s1, params["w2"] * s2,
                          params["w3"] * s3, params["wp"] * sp)
    h = jnp.maximum(conv(x, w1f, 1, "VALID") + b1, 0.0)
    h = jnp.maximum(conv(h, w2f, 2, [(1, 1), (1, 1)]) + b2, 0.0)
    h = conv(h, w3f, 1, "VALID") + b3
    p = conv(x, wpf, 2, "VALID") + bp
    return jnp.transpose(h + p, (0, 3, 1, 2))


# ---------------------------------- main --------------------------------------

if __name__ == "__main__":
    key = jax.random.PRNGKey(0)
    kx, kp = jax.random.split(key)

    B, Cin, H, W = 2, 4, 16, 16
    Cout = 8   # in_channel != out_channel -> stride-2 bottleneck with projection

    x = jax.random.normal(kx, (B, Cin, H, W), jnp.float32)
    params, neck = init_params(kp, Cin, Cout, neck_reduction=4)

    out = jax.block_until_ready(bottleneck_forward(x, params, neck))
    ref = reference_forward(x, params, neck)

    assert out.shape == (B, Cout, H // 2, W // 2), out.shape
    err = float(jnp.max(jnp.abs(out.astype(jnp.float32) - ref)))
    assert err < 5e-2, err        # kernel output is bf16; ref accumulates in f32

    print("KERNEL_OK")
</pallas_src>

<mosaic_0001>
module attributes {stable_mosaic.version = 11 : i64} {
  func.func @_bottleneck_kernel(%arg0: i32, %arg1: memref<1x256x4xbf16, #tpu.memory_space<vmem>>, %arg2: memref<4x128xbf16, #tpu.memory_space<vmem>>, %arg3: memref<1x128xf32, #tpu.memory_space<vmem>>, %arg4: memref<3x384x128xbf16, #tpu.memory_space<vmem>>, %arg5: memref<1x128xf32, #tpu.memory_space<vmem>>, %arg6: memref<128x8xbf16, #tpu.memory_space<vmem>>, %arg7: memref<4x8xbf16, #tpu.memory_space<vmem>>, %arg8: memref<1x8xf32, #tpu.memory_space<vmem>>, %arg9: memref<1x64x8xbf16, #tpu.memory_space<vmem>>) attributes {dimension_semantics = [#tpu.dimension_semantics<parallel>], iteration_bounds = array<i64: 2>, scalar_prefetch = 0 : i64, scratch_operands = 0 : i64, tpu.core_type = #tpu.core_type<tc>, window_params = [{transform_indices = @transform_0, window_bounds = array<i64: 1, 256, 4>}, {pipeline_mode = #tpu.pipeline_mode<synchronous>, transform_indices = @transform_1, window_bounds = array<i64: 4, 128>}, {pipeline_mode = #tpu.pipeline_mode<synchronous>, transform_indices = @transform_2, window_bounds = array<i64: 1, 128>}, {pipeline_mode = #tpu.pipeline_mode<synchronous>, transform_indices = @transform_3, window_bounds = array<i64: 3, 384, 128>}, {pipeline_mode = #tpu.pipeline_mode<synchronous>, transform_indices = @transform_4, window_bounds = array<i64: 1, 128>}, {pipeline_mode = #tpu.pipeline_mode<synchronous>, transform_indices = @transform_5, window_bounds = array<i64: 128, 8>}, {pipeline_mode = #tpu.pipeline_mode<synchronous>, transform_indices = @transform_6, window_bounds = array<i64: 4, 8>}, {pipeline_mode = #tpu.pipeline_mode<synchronous>, transform_indices = @transform_7, window_bounds = array<i64: 1, 8>}, {transform_indices = @transform_8, window_bounds = array<i64: 1, 64, 8>}]} {
    %c0 = arith.constant 0 : index
    %c0_0 = arith.constant 0 : index
    %c0_1 = arith.constant 0 : index
    %0 = vector.load %arg1[%c0, %c0_0, %c0_1] : memref<1x256x4xbf16, #tpu.memory_space<vmem>>, vector<1x256x4xbf16>
    %1 = vector.shape_cast %0 : vector<1x256x4xbf16> to vector<256x4xbf16>
    %c0_2 = arith.constant 0 : index
    %c0_3 = arith.constant 0 : index
    %2 = vector.load %arg2[%c0_2, %c0_3] : memref<4x128xbf16, #tpu.memory_space<vmem>>, vector<4x128xbf16>
    %cst = arith.constant dense<0.000000e+00> : vector<256x128xf32>
    %3 = tpu.matmul %1, %2, %cst {dimension_numbers = #tpu.dot_dimension_numbers<[1], [0], [0], [1], [0, 0, 1, 1], [], []>} : vector<256x4xbf16>, vector<4x128xbf16>, vector<256x128xf32> -> vector<256x128xf32>
    %c0_4 = arith.constant 0 : index
    %c0_5 = arith.constant 0 : index
    %4 = vector.load %arg3[%c0_4, %c0_5] : memref<1x128xf32, #tpu.memory_space<vmem>>, vector<1x128xf32>
    %5 = vector.broadcast %4 : vector<1x128xf32> to vector<256x128xf32>
    %6 = arith.addf %3, %5 : vector<256x128xf32>
    %cst_6 = arith.constant 0.000000e+00 : f32
    %7 = vector.broadcast %cst_6 : f32 to vector<256x128xf32>
    %8 = arith.maximumf %6, %7 : vector<256x128xf32>
    %9 = vector.extract_strided_slice %8 {offsets = [0, 0], sizes = [64, 128], strides = [1, 1]} : vector<256x128xf32> to vector<64x128xf32>
    %10 = vector.extract_strided_slice %8 {offsets = [64, 0], sizes = [64, 128], strides = [1, 1]} : vector<256x128xf32> to vector<64x128xf32>
    %11 = vector.extract_strided_slice %8 {offsets = [128, 0], sizes = [64, 128], strides = [1, 1]} : vector<256x128xf32> to vector<64x128xf32>
    %12 = vector.extract_strided_slice %8 {offsets = [192, 0], sizes = [64, 128], strides = [1, 1]} : vector<256x128xf32> to vector<64x128xf32>
    %13 = tpu.iota {dimensions = array<i32: 0>} : vector<64x128xi32>
    %c8_i32 = arith.constant 8 : i32
    %c0_i32 = arith.constant 0 : i32
    %14 = arith.cmpi eq, %c8_i32, %c0_i32 : i32
    %c1_i32 = arith.constant 1 : i32
    %15 = arith.select %14, %c1_i32, %c8_i32 : i32
    %16 = vector.broadcast %15 : i32 to vector<64x128xi32>
    %17 = arith.remsi %13, %16 : vector<64x128xi32>
    %c0_i32_7 = arith.constant 0 : i32
    %18 = vector.broadcast %c0_i32_7 : i32 to vector<64x128xi32>
    %19 = arith.cmpi ne, %17, %18 : vector<64x128xi32>
    %c0_i32_8 = arith.constant 0 : i32
    %20 = vector.broadcast %c0_i32_8 : i32 to vector<64x128xi32>
    %21 = arith.cmpi slt, %17, %20 : vector<64x128xi32>
    %c0_i32_9 = arith.constant 0 : i32
    %22 = arith.cmpi slt, %15, %c0_i32_9 : i32
    %23 = vector.broadcast %22 : i1 to vector<64x128xi1>
    %24 = vector.broadcast %23 : vector<64x128xi1> to vector<64x128xi1>
    %25 = arith.xori %21, %24 : vector<64x128xi1>
    %26 = arith.andi %25, %19 : vector<64x128xi1>
    %27 = vector.broadcast %15 : i32 to vector<64x128xi32>
    %28 = arith.addi %17, %27 : vector<64x128xi32>
    %29 = arith.select %26, %28, %17 : vector<64x128xi1>, vector<64x128xi32>
    %c0_i32_10 = arith.constant 0 : i32
    %30 = vector.broadcast %c0_i32_10 : i32 to vector<64x128xi32>
    %31 = arith.cmpi ne, %29, %30 : vector<64x128xi32>
    %c8_i32_11 = arith.constant 8 : i32
    %32 = vector.broadcast %c8_i32_11 : i32 to vector<64x128xi32>
    %33 = arith.cmpi sge, %13, %32 : vector<64x128xi32>
    %c1_i32_12 = arith.constant 1 : i32
    %34 = tpu.dynamic_rotate %10 by %c1_i32_12 dim 0 : vector<64x128xf32>, i32 -> vector<64x128xf32>
    %cst_13 = arith.constant 0.000000e+00 : f32
    %35 = vector.broadcast %cst_13 : f32 to vector<64x128xf32>
    %36 = arith.select %31, %34, %35 : vector<64x128xi1>, vector<64x128xf32>
    %c1_i32_14 = arith.constant 1 : i32
    %37 = tpu.dynamic_rotate %12 by %c1_i32_14 dim 0 : vector<64x128xf32>, i32 -> vector<64x128xf32>
    %cst_15 = arith.constant 0.000000e+00 : f32
    %38 = vector.broadcast %cst_15 : f32 to vector<64x128xf32>
    %39 = arith.select %31, %37, %38 : vector<64x128xi1>, vector<64x128xf32>
    %40 = arith.truncf %36 : vector<64x128xf32> to vector<64x128xbf16>
    %41 = arith.truncf %9 : vector<64x128xf32> to vector<64x128xbf16>
    %42 = arith.truncf %10 : vector<64x128xf32> to vector<64x128xbf16>
    %43 = tpu.concatenate %40, %41, %42 in 1 : vector<64x128xbf16>, vector<64x128xbf16>, vector<64x128xbf16> -> vector<64x384xbf16>
    %44 = arith.truncf %39 : vector<64x128xf32> to vector<64x128xbf16>
    %45 = arith.truncf %11 : vector<64x128xf32> to vector<64x128xbf16>
    %46 = arith.truncf %12 : vector<64x128xf32> to vector<64x128xbf16>
    %47 = tpu.concatenate %44, %45, %46 in 1 : vector<64x128xbf16>, vector<64x128xbf16>, vector<64x128xbf16> -> vector<64x384xbf16>
    %c1 = arith.constant 1 : index
    %c0_16 = arith.constant 0 : index
    %c0_17 = arith.constant 0 : index
    %48 = vector.load %arg4[%c1, %c0_16, %c0_17] : memref<3x384x128xbf16, #tpu.memory_space<vmem>>, vector<1x384x128xbf16>
    %49 = vector.shape_cast %48 : vector<1x384x128xbf16> to vector<384x128xbf16>
    %cst_18 = arith.constant dense<0.000000e+00> : vector<64x128xf32>
    %50 = tpu.matmul %43, %49, %cst_18 {dimension_numbers = #tpu.dot_dimension_numbers<[1], [0], [0], [1], [0, 0, 1, 1], [], []>} : vector<64x384xbf16>, vector<384x128xbf16>, vector<64x128xf32> -> vector<64x128xf32>
    %c2 = arith.constant 2 : index
    %c0_19 = arith.constant 0 : index
    %c0_20 = arith.constant 0 : index
    %51 = vector.load %arg4[%c2, %c0_19, %c0_20] : memref<3x384x128xbf16, #tpu.memory_space<vmem>>, vector<1x384x128xbf16>
    %52 = vector.shape_cast %51 : vector<1x384x128xbf16> to vector<384x128xbf16>
    %cst_21 = arith.constant dense<0.000000e+00> : vector<64x128xf32>
    %53 = tpu.matmul %47, %52, %cst_21 {dimension_numbers = #tpu.dot_dimension_numbers<[1], [0], [0], [1], [0, 0, 1, 1], [], []>} : vector<64x384xbf16>, vector<384x128xbf16>, vector<64x128xf32> -> vector<64x128xf32>
    %c0_22 = arith.constant 0 : index
    %c0_23 = arith.constant 0 : index
    %c0_24 = arith.constant 0 : index
    %54 = vector.load %arg4[%c0_22, %c0_23, %c0_24] : memref<3x384x128xbf16, #tpu.memory_space<vmem>>, vector<1x384x128xbf16>
    %55 = vector.shape_cast %54 : vector<1x384x128xbf16> to vector<384x128xbf16>
    %cst_25 = arith.constant dense<0.000000e+00> : vector<64x128xf32>
    %56 = tpu.matmul %47, %55, %cst_25 {dimension_numbers = #tpu.dot_dimension_numbers<[1], [0], [0], [1], [0, 0, 1, 1], [], []>} : vector<64x384xbf16>, vector<384x128xbf16>, vector<64x128xf32> -> vector<64x128xf32>
    %57 = arith.addf %50, %53 : vector<64x128xf32>
    %c8_i32_26 = arith.constant 8 : i32
    %58 = tpu.dynamic_rotate %56 by %c8_i32_26 dim 0 : vector<64x128xf32>, i32 -> vector<64x128xf32>
    %cst_27 = arith.constant 0.000000e+00 : f32
    %59 = vector.broadcast %cst_27 : f32 to vector<64x128xf32>
    %60 = arith.select %33, %58, %59 : vector<64x128xi1>, vector<64x128xf32>
    %61 = arith.addf %57, %60 : vector<64x128xf32>
    %c0_28 = arith.constant 0 : index
    %c0_29 = arith.constant 0 : index
    %62 = vector.load %arg5[%c0_28, %c0_29] : memref<1x128xf32, #tpu.memory_space<vmem>>, vector<1x128xf32>
    %63 = vector.broadcast %62 : vector<1x128xf32> to vector<64x128xf32>
    %64 = arith.addf %61, %63 : vector<64x128xf32>
    %cst_30 = arith.constant 0.000000e+00 : f32
    %65 = vector.broadcast %cst_30 : f32 to vector<64x128xf32>
    %66 = arith.maximumf %64, %65 : vector<64x128xf32>
    %67 = arith.truncf %66 : vector<64x128xf32> to vector<64x128xbf16>
    %68 = vector.extract_strided_slice %1 {offsets = [0, 0], sizes = [64, 4], strides = [1, 1]} : vector<256x4xbf16> to vector<64x4xbf16>
    %c0_31 = arith.constant 0 : index
    %c0_32 = arith.constant 0 : index
    %69 = vector.load %arg6[%c0_31, %c0_32] : memref<128x8xbf16, #tpu.memory_space<vmem>>, vector<128x8xbf16>
    %cst_33 = arith.constant dense<0.000000e+00> : vector<64x8xf32>
    %70 = tpu.matmul %67, %69, %cst_33 {dimension_numbers = #tpu.dot_dimension_numbers<[1], [0], [0], [1], [0, 0, 1, 1], [], []>} : vector<64x128xbf16>, vector<128x8xbf16>, vector<64x8xf32> -> vector<64x8xf32>
    %c0_34 = arith.constant 0 : index
    %c0_35 = arith.constant 0 : index
    %71 = vector.load %arg7[%c0_34, %c0_35] : memref<4x8xbf16, #tpu.memory_space<vmem>>, vector<4x8xbf16>
    %cst_36 = arith.constant dense<0.000000e+00> : vector<64x8xf32>
    %72 = tpu.matmul %68, %71, %cst_36 {dimension_numbers = #tpu.dot_dimension_numbers<[1], [0], [0], [1], [0, 0, 1, 1], [], []>} : vector<64x4xbf16>, vector<4x8xbf16>, vector<64x8xf32> -> vector<64x8xf32>
    %73 = arith.addf %70, %72 : vector<64x8xf32>
    %c0_37 = arith.constant 0 : index
    %c0_38 = arith.constant 0 : index
    %74 = vector.load %arg8[%c0_37, %c0_38] : memref<1x8xf32, #tpu.memory_space<vmem>>, vector<1x8xf32>
    %75 = vector.broadcast %74 : vector<1x8xf32> to vector<64x8xf32>
    %76 = arith.addf %73, %75 : vector<64x8xf32>
    %77 = arith.truncf %76 : vector<64x8xf32> to vector<64x8xbf16>
    %c0_39 = arith.constant 0 : index
    %c0_40 = arith.constant 0 : index
    %c0_41 = arith.constant 0 : index
    %78 = vector.load %arg9[%c0_39, %c0_40, %c0_41] : memref<1x64x8xbf16, #tpu.memory_space<vmem>>, vector<1x64x8xbf16>
    %79 = vector.shape_cast %78 : vector<1x64x8xbf16> to vector<64x8xbf16>
    %80 = vector.shape_cast %77 : vector<64x8xbf16> to vector<1x64x8xbf16>
    tpu.vector_store %arg9[%c0_39, %c0_40, %c0_41], %80 {strides = array<i32>} : memref<1x64x8xbf16, #tpu.memory_space<vmem>>, vector<1x64x8xbf16>,
    return
  }
  func.func @transform_0(%arg0: i32) -> (i32, i32, i32) {
    %c0_i32 = arith.constant 0 : i32
    %c0_i32_0 = arith.constant 0 : i32
    %c0_i32_1 = arith.constant 0 : i32
    return %arg0, %c0_i32, %c0_i32_0 : i32, i32, i32
  }
  func.func @transform_1(%arg0: i32) -> (i32, i32) {
    %c0_i32 = arith.constant 0 : i32
    %c0_i32_0 = arith.constant 0 : i32
    %c0_i32_1 = arith.constant 0 : i32
    return %c0_i32, %c0_i32_0 : i32, i32
  }
  func.func @transform_2(%arg0: i32) -> (i32, i32) {
    %c0_i32 = arith.constant 0 : i32
    %c0_i32_0 = arith.constant 0 : i32
    %c0_i32_1 = arith.constant 0 : i32
    return %c0_i32, %c0_i32_0 : i32, i32
  }
  func.func @transform_3(%arg0: i32) -> (i32, i32, i32) {
    %c0_i32 = arith.constant 0 : i32
    %c0_i32_0 = arith.constant 0 : i32
    %c0_i32_1 = arith.constant 0 : i32
    %c0_i32_2 = arith.constant 0 : i32
    return %c0_i32, %c0_i32_0, %c0_i32_1 : i32, i32, i32
  }
  func.func @transform_4(%arg0: i32) -> (i32, i32) {
    %c0_i32 = arith.constant 0 : i32
    %c0_i32_0 = arith.constant 0 : i32
    %c0_i32_1 = arith.constant 0 : i32
    return %c0_i32, %c0_i32_0 : i32, i32
  }
  func.func @transform_5(%arg0: i32) -> (i32, i32) {
    %c0_i32 = arith.constant 0 : i32
    %c0_i32_0 = arith.constant 0 : i32
    %c0_i32_1 = arith.constant 0 : i32
    return %c0_i32, %c0_i32_0 : i32, i32
  }
  func.func @transform_6(%arg0: i32) -> (i32, i32) {
    %c0_i32 = arith.constant 0 : i32
    %c0_i32_0 = arith.constant 0 : i32
    %c0_i32_1 = arith.constant 0 : i32
    return %c0_i32, %c0_i32_0 : i32, i32
  }
  func.func @transform_7(%arg0: i32) -> (i32, i32) {
    %c0_i32 = arith.constant 0 : i32
    %c0_i32_0 = arith.constant 0 : i32
    %c0_i32_1 = arith.constant 0 : i32
    return %c0_i32, %c0_i32_0 : i32, i32
  }
  func.func @transform_8(%arg0: i32) -> (i32, i32, i32) {
    %c0_i32 = arith.constant 0 : i32
    %c0_i32_0 = arith.constant 0 : i32
    %c0_i32_1 = arith.constant 0 : i32
    return %arg0, %c0_i32, %c0_i32_0 : i32, i32, i32
  }
}

</mosaic_0001>

<bundles_post_ra>
// kernel: bottleneck_forward.1
= control target key start
LH: loop header
LB: loop body
LE: loop exit
PB: predicated region body
PF: predicated region fallthrough
CT: control target
= control target key end

     0   :  { %s2995_s27 = smov 0   ;;  %s3587_s0 = inlined_call_operand.vmem [shape: bf16[2,256,4], index: 0, kind: input, shape index: {}]   ;;  %s3588_s1 = inlined_call_operand.vmem [shape: bf16[4,128], index: 1, kind: input, shape index: {}]   ;;  %s3589_s2 = inlined_call_operand.vmem [shape: f32[1,128], index: 2, kind: input, shape index: {}]   ;;  %s3590_s3 = inlined_call_operand.vmem [shape: bf16[3,384,128], index: 3, kind: input, shape index: {}]   ;;  %s3591_s4 = inlined_call_operand.vmem [shape: f32[1,128], index: 4, kind: input, shape index: {}]   ;;  %s3592_s5 = inlined_call_operand.vmem [shape: bf16[128,8], index: 5, kind: input, shape index: {}]   ;;  %s3593_s6 = inlined_call_operand.vmem [shape: bf16[4,8], index: 6, kind: input, shape index: {}]   ;;  %s3594_s7 = inlined_call_operand.vmem [shape: f32[1,8], index: 7, kind: input, shape index: {}]   ;;  %s3595_s8 = inlined_call_operand.vmem [shape: bf16[2,64,8], index: 8, kind: output, shape index: {}]  }
   0x1 LB: > { %s2187_s28 = sadd.s32 4294967295, %s2948_s27   ;;  %p2191_p0 = scmp.ge.s32.totalorder %s2948_s27, 1  ;;  %s2948_s27 = sphi %s2995_s27, %s18_s27  }
   0x2   : > { %p262_p1 = scmp.lt.s32.totalorder %s2948_s27, 3 }
   0x4   : > { %p263_p2 = pnand %p2191_p0, %p262_p1 }
   0x5   : > { %v339_v0 = vld [vmem:[%s3588_s1] sm:$0x3] (!%p263_p2)  ;;  %vm476_vm0 = vcmask (!%p263_p2), 1041408   ;;  %p296_p3 = scmp.lt.s32.totalorder (!%p263_p2), %s2187_s28, 1  ;;  %vm427_vm1 = vcmask (!%p263_p2), 31744   ;;  %v2862_v22 = vld [vmem:[%s3590_s3 + $0x1c8] sm:$0xff] (!%p263_p2)  }
   0x6   : > { %266 = sbr.rel (%p263_p2) target bundleno = 815 (0x32f), region = 52  ;;  %2832 = vmatprep.subr.msk.bf16.mxu1 (!%p263_p2), %vm476_vm0, %v339_v0  ;;  %v478_v1 = vsel (!%p263_p2), %vm476_vm0, %v339_v0, 0  ;;  %2831 = vmatprep.subr.msk.bf16.mxu0 (!%p263_p2), %vm476_vm0, %v339_v0  ;;  %v2858_v18 = vld [vmem:[%s3590_s3 + $0x1c0] sm:$0xff] (!%p263_p2)   ;;  %v2863_v23 = vld [vmem:[%s3590_s3 + $0x188] sm:$0xff] (!%p263_p2)   ;;  %v2866_v26 = vld [vmem:[%s3590_s3 + $0x1d0] sm:$0xff] (!%p263_p2)   ;;  %vm2123_vm15 = vcmask (!%p263_p2), 60416  }
   0x7   : > { %2798 = vmatpush3.bf16.msra.mxu1 (!%p263_p2), %v478_v1  ;;  %2658 = vmatpush3.bf16.msra.mxu0 (!%p263_p2), %v478_v1  ;;  %v2859_v19 = vld [vmem:[%s3590_s3 + $0x180] sm:$0xff] (!%p263_p2)   ;;  %v2864_v24 = vld [vmem:[%s3590_s3 + $0x48] sm:$0xff] (!%p263_p2)   ;;  %v2867_v27 = vld [vmem:[%s3590_s3 + $0x190] sm:$0xff] (!%p263_p2)  }
   0x8   : > { %v2860_v20 = vld [vmem:[%s3590_s3 + $0x40] sm:$0xff] (!%p263_p2)   ;;  %2484 = vmatprep.subr.bf16.mxu1 (!%p263_p2), %v2858_v18  ;;  %v2865_v25 = vld [vmem:[%s3590_s3 + $0x8] sm:$0xff] (!%p263_p2)   ;;  %v2868_v28 = vld [vmem:[%s3590_s3 + $0x50] sm:$0xff] (!%p263_p2)  }
   0x9   : > { %v2861_v21 = vld [vmem:[%s3590_s3] sm:$0xff] (!%p263_p2)   ;;  %2536 = vmatprep.subr.bf16.mxu0 (!%p263_p2), %v2860_v20  ;;  %v2869_v29 = vld [vmem:[%s3590_s3 + $0x10] sm:$0xff] (!%p263_p2)   ;;  %v2870_v30 = vld [vmem:[%s3590_s3 + $0x1d8] sm:$0xff] (!%p263_p2)  }
   0xa   : > { %v2871_v31 = vld [vmem:[%s3590_s3 + $0x198] sm:$0xff] (!%p263_p2)   ;;  %v2874_v34 = vld [vmem:[%s3590_s3 + $0x1e0] sm:$0xff] (!%p263_p2)   ;;  %v2878_v38 = vld [vmem:[%s3590_s3 + $0x1e8] sm:$0xff] (!%p263_p2)  }
   0xb   : > { %v2872_v32 = vld [vmem:[%s3590_s3 + $0x58] sm:$0xff] (!%p263_p2)   ;;  %v2875_v35 = vld [vmem:[%s3590_s3 + $0x1a0] sm:$0xff] (!%p263_p2)   ;;  %v2879_v39 = vld [vmem:[%s3590_s3 + $0x1a8] sm:$0xff] (!%p263_p2)  }
   0xc   : > { %v2873_v33 = vld [vmem:[%s3590_s3 + $0x18] sm:$0xff] (!%p263_p2)   ;;  %v2876_v36 = vld [vmem:[%s3590_s3 + $0x60] sm:$0xff] (!%p263_p2)   ;;  %v2880_v40 = vld [vmem:[%s3590_s3 + $0x68] sm:$0xff] (!%p263_p2)  }
   0xd   : > { %s3613_s28 = smov (!%p296_p3, %s2187_s28), 1  ;;  %v2877_v37 = vld [vmem:[%s3590_s3 + $0x20] sm:$0xff]   ;;  %v2881_v41 = vld [vmem:[%s3590_s3 + $0x28] sm:$0xff]   ;;  %v2882_v42 = vld [vmem:[%s3590_s3 + $0x1f0] sm:$0xff]  }
   0xe   : > { %s2457_s9 = sshll.u32 %s3613_s28, 7  ;;  %v2883_v43 = vld [vmem:[%s3590_s3 + $0x1b0] sm:$0xff]   ;;  %v2886_v46 = vld [vmem:[%s3590_s3 + $0x1f8] sm:$0xff]   ;;  %v3148_v50 = vld [vmem:[%s3590_s3 + $0x200] sm:$0xff]   ;;  %s2458_s30 = sshll.u32 %s3613_s28, 5 }
   0xf   : > { %s3015_s12 = scalar_lea.vmem %s3587_s0, %s2457_s9  ;;  %v2884_v44 = vld [vmem:[%s3590_s3 + $0x70] sm:$0xff]   ;;  %v2887_v47 = vld [vmem:[%s3590_s3 + $0x1b8] sm:$0xff]   ;;  %v2891_v51 = vld [vmem:[%s3590_s3 + $0x100] sm:$0xff]   ;;  %s305_s11 = scalar_lea.vmem %s3595_s8, %s2458_s30 }
  0x10   : > { %v2842_v2 = vld [vmem:[%s3015_s12 + $0x40] sm:$0xff]   ;;  %v2843_v3 = vld [vmem:[%s3015_s12 + $0x48] sm:$0xff]   ;;  %v2844_v4 = vld [vmem:[%s3015_s12 + $0x50] sm:$0xff]  }
  0x11   : > { %2675 = vmatprep.mubr.msk.bf16.mxu1 %vm427_vm1, %v2842_v2  ;;  %v2845_v5 = vld [vmem:[%s3015_s12 + $0x58] sm:$0xff]   ;;  %v2846_v6 = vld [vmem:[%s3015_s12 + $0x60] sm:$0xff]   ;;  %v2851_v8 = vld [vmem:[%s3015_s12 + $0x8] sm:$0xff]  }
  0x12   : > { %2676 = vmatmul.mubr.msk.bf16.vlgmr.msra.gmra.mrb[0].mxu1 %vm427_vm1, %v2843_v3  ;;  %v2850_v7 = vld [vmem:[%s3015_s12] sm:$0xff]   ;;  %v2852_v9 = vld [vmem:[%s3015_s12 + $0x10] sm:$0xff]   ;;  %v2847_v10 = vld [vmem:[%s3015_s12 + $0x68] sm:$0xff]  }
  0x13   : > { %2679 = vmatprep.mubr.msk.bf16.mxu1 %vm427_vm1, %v2844_v4  ;;  %2659 = vmatprep.mubr.msk.bf16.mxu0 %vm427_vm1, %v2850_v7  ;;  %v2848_v11 = vld [vmem:[%s3015_s12 + $0x70] sm:$0xff]   ;;  %v2853_v12 = vld [vmem:[%s3015_s12 + $0x18] sm:$0xff]   ;;  %v2854_v13 = vld [vmem:[%s3015_s12 + $0x20] sm:$0xff]   ;;  %v673_v4 = vlaneseq }
  0x14   : > { %2660 = vmatmul.mubr.msk.bf16.vlgmr.msra.gmra.mrb[0].mxu0 %vm427_vm1, %v2851_v8  ;;  %v2849_v14 = vld [vmem:[%s3015_s12 + $0x78] sm:$0xff]   ;;  %v2855_v15 = vld [vmem:[%s3015_s12 + $0x28] sm:$0xff]   ;;  %v2856_v16 = vld [vmem:[%s3015_s12 + $0x30] sm:$0xff]   ;;  %2485 = vmatpush3.bf16.msra.mxu1 %v2859_v19 }
  0x15   : > { %2663 = vmatprep.mubr.msk.bf16.mxu0 %vm427_vm1, %v2852_v9  ;;  %v2857_v17 = vld [vmem:[%s3015_s12 + $0x38] sm:$0xff]   ;;  %2537 = vmatpush3.bf16.msra.mxu0 %v2861_v21  ;;  %v2885_v45 = vld [vmem:[%s3590_s3 + $0x30] sm:$0xff]   ;;  %v3157_v52 = vld [vmem:[%s3589_s2] ss:$0 sm:$0xff]  ;;  %v3172_v20 = vshrl.u32 %v673_v4, 7 }
  0x16   : > { %2486 = vmatprep.subr.bf16.mxu1 %v2862_v22  ;;  %2538 = vmatprep.subr.bf16.mxu0 %v2864_v24  ;;  %v2888_v48 = vld [vmem:[%s3590_s3 + $0x78] sm:$0xff]  }
  0x17   : > { %v2889_v49 = vld [vmem:[%s3590_s3 + $0x38] sm:$0xff]   ;;  %vm802_vm2 = vcmp.lt.s32.totalorder %v3172_v20, 1 }
  0x18   : > { %2487 = vmatpush3.bf16.msra.mxu1 %v2863_v23 }
  0x19   : > { %2539 = vmatpush3.bf16.msra.mxu0 %v2865_v25  ;;  %2488 = vmatprep.subr.bf16.mxu1 %v2866_v26 }
  0x1a   : > { %2680 = vmatmul.mubr.msk.bf16.gmra.mrb[4].mxu1 %vm427_vm1, %v2845_v5  ;;  %2540 = vmatprep.subr.bf16.mxu0 %v2868_v28  ;;  %v675_v28 = vadd.s32 8, %v3172_v20 }
  0x1b   : > { %2683 = vmatprep.mubr.msk.bf16.mxu1 %vm427_vm1, %v2846_v6 }
  0x1c   : > { %2664 = vmatmul.mubr.msk.bf16.gmra.mrb[4].mxu0 %vm427_vm1, %v2853_v12  ;;  %2489 = vmatpush3.bf16.msra.mxu1 %v2867_v27 }
  0x1d   : > { %2667 = vmatprep.mubr.msk.bf16.mxu0 %vm427_vm1, %v2854_v13  ;;  %2541 = vmatpush3.bf16.msra.mxu0 %v2869_v29 }
  0x1e   : > { %2490 = vmatprep.subr.bf16.mxu1 %v2870_v30  ;;  %2542 = vmatprep.subr.bf16.mxu0 %v2872_v32 }
  0x20   : > { %2491 = vmatpush3.bf16.msra.mxu1 %v2871_v31 }
  0x21   : > { %2543 = vmatpush3.bf16.msra.mxu0 %v2873_v33  ;;  %2492 = vmatprep.subr.bf16.mxu1 %v2874_v34 }
  0x22   : > { %2684 = vmatmul.mubr.msk.bf16.gmra.mrb[8].mxu1 %vm427_vm1, %v2847_v10  ;;  %2544 = vmatprep.subr.bf16.mxu0 %v2876_v36 }
  0x23   : > { %2687 = vmatprep.mubr.msk.bf16.mxu1 %vm427_vm1, %v2848_v11 }
  0x24   : > { %2668 = vmatmul.mubr.msk.bf16.gmra.mrb[8].mxu0 %vm427_vm1, %v2855_v15  ;;  %2493 = vmatpush3.bf16.msra.mxu1 %v2875_v35 }
  0x25   : > { %2671 = vmatprep.mubr.msk.bf16.mxu0 %vm427_vm1, %v2856_v16  ;;  %2545 = vmatpush3.bf16.msra.mxu0 %v2877_v37 }
  0x26   : > { %2494 = vmatprep.subr.bf16.mxu1 %v2878_v38  ;;  %2546 = vmatprep.subr.bf16.mxu0 %v2880_v40 }
  0x28   : > { %2495 = vmatpush3.bf16.msra.mxu1 %v2879_v39 }
  0x29   : > { %2547 = vmatpush3.bf16.msra.mxu0 %v2881_v41  ;;  %2496 = vmatprep.subr.bf16.mxu1 %v2882_v42  ;;  %v686_v42 = vand.u32 7, %v3172_v20 }
  0x2a   : > { %2688 = vmatmul.mubr.msk.bf16.gmra.mrb[12].mxu1 %vm427_vm1, %v2849_v14  ;;  %2548 = vmatprep.subr.bf16.mxu0 %v2884_v44 }
  0x2b   : > { %vm3195_vm3 = vcmp.ne.s32.totalorder %v686_v42, 0 }
  0x2c   : > { %2672 = vmatmul.mubr.msk.bf16.gmra.mrb[12].mxu0 %vm427_vm1, %v2857_v17  ;;  %2497 = vmatpush3.bf16.msra.mxu1 %v2883_v43  ;;  %v693_v43 = vand.u32 7, %v675_v28 }
  0x2d   : > { %2549 = vmatpush3.bf16.msra.mxu0 %v2885_v45  ;;  %2498 = vmatprep.subr.bf16.mxu1 %v2886_v46 }
  0x2e   : > { %2550 = vmatprep.subr.bf16.mxu0 %v2888_v48  ;;  %vm3199_vm4 = vcmp.ne.s32.totalorder %v693_v43, 0 }
  0x2f   : > { %vm3251_vm6 = vmpackc.low %vm3199_vm4, %vm3195_vm3 }
  0x30   : > { %2499 = vmatpush3.bf16.msra.mxu1 %v2887_v47 }
  0x31   : > { %2551 = vmatpush3.bf16.msra.mxu0 %v2889_v49  ;;  %2691 = vmatprep.subr.bf16.mxu1 %v3148_v50 }
  0x32   : > { %2588 = vmatprep.subr.bf16.mxu0 %v2891_v51 }
  0xe5   : > { %v2677_v53 = vpop.f32.mrb[0].mxu1 }
  0xe6   : > { %v587_v54 = vadd.f32 %v2677_v53, %v3157_v52  ;;  %v578_v55 = vpop.f32.mrb[1].mxu1 }
  0xe7   : > { %v579_v56 = vadd.f32 %v3157_v52, %v578_v55  ;;  %v2678_v57 = vpop.f32.mrb[2].mxu1  ;;  %v2661_v5 = vpop.f32.mrb[0].mxu0 }
  0xe8   : > { %v590_v58 = vadd.f32 %v2678_v57, %v3157_v52  ;;  %v581_v59 = vpop.f32.mrb[3].mxu1  ;;  %v659_v61 = vmax.f32 %v587_v54, 0.0  ;;  %v523_v8 = vadd.f32 %v2661_v5, %v3157_v52  ;;  %v514_v9 = vpop.f32.mrb[1].mxu0 }
  0xe9   : > { %v582_v60 = vadd.f32 %v3157_v52, %v581_v59  ;;  %v657_v63 = vmax.f32 %v579_v56, 0.0  ;;  %v515_v12 = vadd.f32 %v3157_v52, %v514_v9  ;;  %v2662_v13 = vpop.f32.mrb[2].mxu0  ;;  %v676_v59 = vadd.s32 16, %v3172_v20 }
  0xea   : > { %v660_v62 = vmax.f32 %v590_v58, 0.0  ;;  %v643_v16 = vmax.f32 %v523_v8, 0.0  ;;  %v526_v17 = vadd.f32 %v2662_v13, %v3157_v52  ;;  %v517_v18 = vpop.f32.mrb[3].mxu0 }
  0xeb   : > { %v658_v0 = vmax.f32 %v582_v60, 0.0  ;;  %v641_v21 = vmax.f32 %v515_v12, 0.0  ;;  %v518_v22 = vadd.f32 %v3157_v52, %v517_v18 }
  0xec   : > { %v3163_v1 = vpack.c.bf16 %v660_v62, %v659_v61  ;;  %v644_v25 = vmax.f32 %v526_v17, 0.0  ;;  %v2892_v62 = vld [vmem:[%s3590_s3 + $0xc0] sm:$0xff]  }
  0xed   : > { %v859_v2 = vpack.c.bf16 %v658_v0, %v657_v63  ;;  %v2681_v3 = vpop.f32.mrb[4].mxu1  ;;  %v642_v29 = vmax.f32 %v518_v22, 0.0  ;;  %v3204_v0 = vadd.s32 24, %v3172_v20 }
  0xee   : > { %v603_v6 = vadd.f32 %v2681_v3, %v3157_v52  ;;  %v594_v7 = vpop.f32.mrb[5].mxu1  ;;  %v3178_v31 = vpack.c.bf16 %v644_v25, %v643_v16  ;;  %v700_v16 = vand.u32 7, %v676_v59 }
  0xef   : > { %v595_v10 = vadd.f32 %v3157_v52, %v594_v7  ;;  %v2682_v11 = vpop.f32.mrb[6].mxu1  ;;  %1141 = vmatprep.mubr.bf16.mxu1 %v859_v2  ;;  %1463 = vmatprep.mubr.bf16.mxu0 %v859_v2  ;;  %v3182_v34 = vpack.c.bf16 %v642_v29, %v641_v21  ;;  %v2665_v35 = vpop.f32.mrb[4].mxu0  ;;  %v707_v42 = vand.u32 7, %v3204_v0  ;;  %v2919_v0 = vld [vmem:[%s3590_s3 + $0xa8] sm:$0xff]  }
  0xf0   : > { %v606_v14 = vadd.f32 %v2682_v11, %v3157_v52  ;;  %v597_v15 = vpop.f32.mrb[7].mxu1  ;;  %v663_v23 = vmax.f32 %v603_v6, 0.0  ;;  %v539_v38 = vadd.f32 %v2665_v35, %v3157_v52  ;;  %v530_v39 = vpop.f32.mrb[5].mxu0  ;;  %vm3231_vm5 = vcmp.ne.s32.totalorder %v700_v16, 0 }
  0xf1   : > { %v598_v19 = vadd.f32 %v3157_v52, %v597_v15  ;;  %v661_v26 = vmax.f32 %v595_v10, 0.0  ;;  %v531_v44 = vadd.f32 %v3157_v52, %v530_v39  ;;  %v2666_v45 = vpop.f32.mrb[6].mxu0  ;;  %vm3291_vm7 = vcmp.ne.s32.totalorder %v707_v42, 0 }
  0xf2   : > { %v664_v24 = vmax.f32 %v606_v14, 0.0  ;;  %v647_v49 = vmax.f32 %v539_v38, 0.0  ;;  %v542_v51 = vadd.f32 %v2666_v45, %v3157_v52  ;;  %v533_v53 = vpop.f32.mrb[7].mxu0  ;;  %vm3323_vm8 = vmpackc.low %vm3291_vm7, %vm3231_vm5 }
  0xf3   : > { %v662_v27 = vmax.f32 %v598_v19, 0.0  ;;  %v645_v56 = vmax.f32 %v531_v44, 0.0  ;;  %v534_v57 = vadd.f32 %v3157_v52, %v533_v53 }
  0xf4   : > { %v3176_v30 = vpack.c.bf16 %v664_v24, %v663_v23  ;;  %v648_v60 = vmax.f32 %v542_v51, 0.0 }
  0xf5   : > { %v3180_v32 = vpack.c.bf16 %v662_v27, %v661_v26  ;;  %v2685_v33 = vpop.f32.mrb[8].mxu1  ;;  %v646_v2 = vmax.f32 %v534_v57, 0.0 }
  0xf6   : > { %v619_v36 = vadd.f32 %v2685_v33, %v3157_v52  ;;  %v610_v37 = vpop.f32.mrb[9].mxu1  ;;  %v3208_v6 = vpack.c.bf16 %v648_v60, %v647_v49 }
  0xf7   : > { %v611_v40 = vadd.f32 %v3157_v52, %v610_v37  ;;  %v2686_v41 = vpop.f32.mrb[10].mxu1  ;;  %v3212_v11 = vpack.c.bf16 %v646_v2, %v645_v56  ;;  %v2669_v12 = vpop.f32.mrb[8].mxu0 }
  0xf8   : > { %v667_v46 = vmax.f32 %v619_v36, 0.0  ;;  %v622_v47 = vadd.f32 %v2686_v41, %v3157_v52  ;;  %v613_v48 = vpop.f32.mrb[11].mxu1  ;;  %v555_v17 = vadd.f32 %v2669_v12, %v3157_v52  ;;  %v546_v18 = vpop.f32.mrb[9].mxu0 }
  0xf9   : > { %v665_v54 = vmax.f32 %v611_v40, 0.0  ;;  %v614_v55 = vadd.f32 %v3157_v52, %v613_v48  ;;  %v547_v24 = vadd.f32 %v3157_v52, %v546_v18  ;;  %v2670_v25 = vpop.f32.mrb[10].mxu0 }
  0xfa   : > { %v668_v58 = vmax.f32 %v622_v47, 0.0  ;;  %v821_v3 = vrot.slane %v667_v46, 7  ;;  %v651_v33 = vmax.f32 %v555_v17, 0.0  ;;  %v549_v35 = vpop.f32.mrb[11].mxu0  ;;  %v558_v39 = vadd.f32 %v2670_v25, %v3157_v52 }
  0xfb   : > { %v666_v61 = vmax.f32 %v614_v55, 0.0  ;;  %v819_v7 = vrot.slane %v665_v54, 7  ;;  %v649_v38 = vmax.f32 %v547_v24, 0.0  ;;  %v550_v43 = vadd.f32 %v3157_v52, %v549_v35 }
  0xfc   : > { %v822_v4 = vrot.slane %v668_v58, 7  ;;  %v3206_v5 = vpack.c.bf16 %v668_v58, %v667_v46  ;;  %v796_v47 = vrot.slane %v651_v33, 7  ;;  %v652_v48 = vmax.f32 %v558_v39, 0.0 }
  0xfd   : > { %v820_v8 = vrot.slane %v666_v61, 7  ;;  %v3210_v9 = vpack.c.bf16 %v666_v61, %v665_v54  ;;  %v2689_v10 = vpop.f32.mrb[12].mxu1  ;;  %v3237_v53 = vrot.slane %v649_v38, 7  ;;  %v650_v54 = vmax.f32 %v550_v43, 0.0  ;;  %v2937_v43 = vld [vmem:[%s3592_s5 + $0x38] sm:$0xff]  }
  0xfe   : > { %v831_v13 = vsel %vm802_vm2, %v821_v3, %v822_v4  ;;  %v635_v14 = vadd.f32 %v2689_v10, %v3157_v52  ;;  %v626_v15 = vpop.f32.mrb[13].mxu1  ;;  %v797_v58 = vrot.slane %v652_v48, 7  ;;  %v3255_v2 = vpack.c.bf16 %v652_v48, %v651_v33  ;;  %v2895_v33 = vld [vmem:[%s3590_s3 + $0xc8] sm:$0xff]   ;;  %v2898_v48 = vld [vmem:[%s3590_s3 + $0xd0] sm:$0xff]  }
  0xff   : > { %v832_v19 = vsel %vm802_vm2, %v820_v8, %v821_v3  ;;  %v833_v21 = vsel %vm802_vm2, %v819_v7, %v820_v8  ;;  %v627_v22 = vadd.f32 %v3157_v52, %v626_v15  ;;  %v2690_v23 = vpop.f32.mrb[14].mxu1  ;;  %v2673_v59 = vpop.f32.mrb[12].mxu0  ;;  %v795_v3 = vrot.slane %v650_v54, 7 }
 0x100   : > { %v671_v26 = vmax.f32 %v635_v14, 0.0  ;;  %v638_v27 = vadd.f32 %v2690_v23, %v3157_v52  ;;  %v629_v28 = vpop.f32.mrb[15].mxu1  ;;  %v3225_v29 = vpack.c.bf16 %v831_v13, %v832_v19  ;;  %v3266_v63 = vsel %vm802_vm2, %v796_v47, %v797_v58  ;;  %v2893_v13 = vld [vmem:[%s3590_s3 + $0x208] sm:$0xff]  }
 0x101   : > { %v669_v36 = vmax.f32 %v627_v22, 0.0  ;;  %v630_v37 = vadd.f32 %v3157_v52, %v629_v28  ;;  %v2894_v14 = vld [vmem:[%s3590_s3 + $0x108] sm:$0xff]   ;;  %v3278_v16 = vsel %vm802_vm2, %v795_v3, %v796_v47  ;;  %v3283_v17 = vsel %vm802_vm2, %v3237_v53, %v795_v3 }
 0x102   : > { %v825_v40 = vrot.slane %v671_v26, 7  ;;  %v672_v41 = vmax.f32 %v638_v27, 0.0  ;;  %v3285_v18 = vpack.c.bf16 %v650_v54, %v649_v38  ;;  %v571_v22 = vadd.f32 %v2673_v59, %v3157_v52  ;;  %v2900_v59 = vld [vmem:[%s3590_s3 + $0x118] sm:$0xff]  }
 0x103   : > { %v823_v44 = vrot.slane %v669_v36, 7  ;;  %v670_v45 = vmax.f32 %v630_v37, 0.0  ;;  %v678_v25 = vadd.s32 32, %v3172_v20  ;;  %v2425_v28 = vpack.c.bf16 %v3266_v63, %v3278_v16  ;;  %v2922_v63 = vld [vmem:[%s3590_s3 + $0x140] sm:$0xff]  }
 0x104   : > { %v826_v49 = vrot.slane %v672_v41, 7  ;;  %v3235_v51 = vpack.c.bf16 %v672_v41, %v671_v26  ;;  %v679_v35 = vadd.s32 40, %v3172_v20  ;;  %v2938_v16 = vld [vmem:[%s3015_s12] sm:$0xff]  }
 0x105   : > { %v830_v55 = vsel %vm802_vm2, %v822_v4, %v823_v44  ;;  %v824_v56 = vrot.slane %v670_v45, 7  ;;  %v3241_v57 = vpack.c.bf16 %v670_v45, %v669_v36  ;;  %v562_v4 = vpop.f32.mrb[13].mxu0  ;;  %v655_v36 = vmax.f32 %v571_v22, 0.0  ;;  %v2910_v22 = vld [vmem:[%s3590_s3 + $0xf0] sm:$0xff]  }
 0x106   : > { %v827_v60 = vsel %vm802_vm2, %v825_v40, %v826_v49  ;;  %v834_v61 = vsel %vm802_vm2, %v826_v49, %v819_v7  ;;  %v2674_v7 = vpop.f32.mrb[14].mxu0  ;;  %v563_v23 = vadd.f32 %v3157_v52, %v562_v4  ;;  %v721_v49 = vand.u32 7, %v679_v35  ;;  %v2901_v4 = vld [vmem:[%s3590_s3 + $0xd8] sm:$0xff]  }
 0x107   : > { %v2350_v8 = vpack.c.bf16 %v833_v21, %v834_v61  ;;  %v828_v10 = vsel %vm802_vm2, %v824_v56, %v825_v40  ;;  %v829_v12 = vsel %vm802_vm2, %v823_v44, %v824_v56  ;;  %v565_v19 = vpop.f32.mrb[15].mxu0  ;;  %v574_v24 = vadd.f32 %v2674_v7, %v3157_v52  ;;  %v2899_v56 = vld [vmem:[%s3590_s3 + $0x218] sm:$0xff]   ;;  %v2908_v21 = vld [vmem:[%s3590_s3 + $0x230] sm:$0xff]  }
 0x108   : > { %v3274_v15 = vpack.c.bf16 %v829_v12, %v830_v55  ;;  %v3301_v26 = vpack.c.bf16 %v827_v60, %v828_v10  ;;  %v566_v27 = vadd.f32 %v3157_v52, %v565_v19  ;;  %v653_v37 = vmax.f32 %v563_v23, 0.0  ;;  %v2897_v52 = vld [vmem:[%s3590_s3 + $0x110] sm:$0xff]   ;;  %v2907_v19 = vld [vmem:[%s3590_s3 + $0xe8] sm:$0xff]   ;;  %v2911_v23 = vld [vmem:[%s3590_s3 + $0x238] sm:$0xff]  }
 0x109   : > { %2351 = vmatmul.mubr.msk.bf16.vlgmr.msra.gmra.mrb[16].mxu1 %vm3251_vm6, %v2350_v8  ;;  %2387 = vmatmul.mubr.msk.bf16.vlgmr.msra.gmra.mrb[16].mxu0 %vm3251_vm6, %v2350_v8  ;;  %v656_v38 = vmax.f32 %v574_v24, 0.0  ;;  %v800_v39 = vrot.slane %v655_v36, 7  ;;  %v714_v44 = vand.u32 7, %v678_v25  ;;  %vm783_vm10 = vcmp.ne.s32.totalorder %v721_v49, 0  ;;  %v2912_v24 = vld [vmem:[%s3590_s3 + $0x138] sm:$0xff]  }
 0x10a   : > { %2692 = vmatpush3.bf16.msra.mxu1 %v3148_v50  ;;  %1149 = vmatprep.mubr.bf16.mxu1 %v3163_v1  ;;  %v2896_v50 = vld [vmem:[%s3590_s3 + $0x210] sm:$0xff]   ;;  %v798_v40 = vrot.slane %v653_v37, 7  ;;  %v680_v8 = vadd.s32 48, %v3172_v20  ;;  %v681_v10 = vadd.s32 56, %v3172_v20  ;;  %v2905_v20 = vld [vmem:[%s3590_s3 + $0x228] sm:$0xff]   ;;  %v2913_v25 = vld [vmem:[%s3590_s3 + $0xf8] sm:$0xff]  }
 0x10b   : > { %1471 = vmatprep.mubr.bf16.mxu0 %v3163_v1  ;;  %2589 = vmatpush3.bf16.msra.mxu0 %v2892_v62  ;;  %v654_v1 = vmax.f32 %v566_v27, 0.0  ;;  %v801_v41 = vrot.slane %v656_v38, 7  ;;  %v3317_v42 = vpack.c.bf16 %v656_v38, %v655_v36  ;;  %vm782_vm9 = vcmp.ne.s32.totalorder %v714_v44, 0  ;;  %v2904_v62 = vld [vmem:[%s3590_s3 + $0xe0] sm:$0xff]   ;;  %v2939_v36 = vld [vmem:[%s3015_s12 + $0x8] sm:$0xff]  }
 0x10c   : > { %2693 = vmatprep.subr.bf16.mxu1 %v2893_v13  ;;  %2590 = vmatprep.subr.bf16.mxu0 %v2894_v14  ;;  %v3334_v46 = vsel %vm802_vm2, %v797_v58, %v798_v40  ;;  %vm3384_vm11 = vmpackc.low %vm783_vm10, %vm782_vm9  ;;  %v728_v7 = vand.u32 7, %v680_v8  ;;  %v2906_v14 = vld [vmem:[%s3590_s3 + $0x128] sm:$0xff]   ;;  %v2914_v27 = vld [vmem:[%s3590_s3 + $0x80] sm:$0xff]  }
 0x10d   : > { %v799_v45 = vrot.slane %v654_v1, 7  ;;  %v3327_v47 = vpack.c.bf16 %v654_v1, %v653_v37  ;;  %v3338_v54 = vsel %vm802_vm2, %v800_v39, %v801_v41  ;;  %v3343_v55 = vsel %vm802_vm2, %v801_v41, %v3237_v53  ;;  %v2940_v37 = vld [vmem:[%s3015_s12 + $0x10] sm:$0xff]   ;;  %v2930_v38 = vld [vmem:[%s3592_s5] sm:$0xff]   ;;  %v2935_v41 = vld [vmem:[%s3592_s5 + $0x28] sm:$0xff]  }
 0x10e   : > { %2694 = vmatpush3.bf16.msra.mxu1 %v2893_v13  ;;  %v2422_v58 = vpack.c.bf16 %v3283_v17, %v3343_v55  ;;  %v735_v13 = vand.u32 7, %v681_v10  ;;  %vm784_vm12 = vcmp.ne.s32.totalorder %v728_v7, 0  ;;  %v2924_v17 = vld [vmem:[%s3590_s3 + $0x150] sm:$0xff]  }
 0x10f   : > { %2591 = vmatpush3.bf16.msra.mxu0 %v2895_v33  ;;  %2695 = vmatprep.subr.bf16.mxu1 %v2896_v50  ;;  %v3355_v60 = vsel %vm802_vm2, %v799_v45, %v800_v39  ;;  %v3359_v53 = vsel %vm802_vm2, %v798_v40, %v799_v45  ;;  %v2917_v33 = vld [vmem:[%s3590_s3 + $0x98] sm:$0xff]   ;;  %v2932_v1 = vld [vmem:[%s3592_s5 + $0x10] sm:$0xff]   ;;  %v2934_v40 = vld [vmem:[%s3592_s5 + $0x20] sm:$0xff]  }
 0x110   : > { %2592 = vmatprep.subr.bf16.mxu0 %v2897_v52  ;;  %v2428_v61 = vpack.c.bf16 %v3359_v53, %v3334_v46  ;;  %v2431_v3 = vpack.c.bf16 %v3338_v54, %v3355_v60  ;;  %vm785_vm13 = vcmp.ne.s32.totalorder %v735_v13, 0  ;;  %v2931_v52 = vld [vmem:[%s3592_s5 + $0x8] sm:$0xff]   ;;  %v2933_v39 = vld [vmem:[%s3592_s5 + $0x18] sm:$0xff]  }
 0x111   : > { %2354 = vmatmul.mubr.msk.bf16.gmra.mrb[20].mxu1 %vm3323_vm8, %v3225_v29  ;;  %2390 = vmatmul.mubr.msk.bf16.gmra.mrb[20].mxu0 %vm3323_vm8, %v3225_v29  ;;  %v2902_v29 = vld [vmem:[%s3590_s3 + $0x220] sm:$0xff]   ;;  %vm3414_vm14 = vmpackc.low %vm785_vm13, %vm784_vm12 }
 0x112   : > { %2696 = vmatpush3.bf16.msra.mxu1 %v2896_v50  ;;  %1157 = vmatprep.mubr.bf16.mxu1 %v3180_v32  ;;  %v1894_v50 = vld [vmem:[%s3593_s6] sm:$0x3] }
 0x113   : > { %1479 = vmatprep.mubr.bf16.mxu0 %v3180_v32  ;;  %2593 = vmatpush3.bf16.msra.mxu0 %v2898_v48  ;;  %v2903_v32 = vld [vmem:[%s3590_s3 + $0x120] sm:$0xff]   ;;  %v1896_v35 = vsel %vm476_vm0, %v1894_v50, 0 }
 0x114   : > { %2697 = vmatprep.subr.bf16.mxu1 %v2899_v56  ;;  %2594 = vmatprep.subr.bf16.mxu0 %v2900_v59 }
 0x116   : > { %2698 = vmatpush3.bf16.msra.mxu1 %v2899_v56 }
 0x117   : > { %2595 = vmatpush3.bf16.msra.mxu0 %v2901_v4  ;;  %2699 = vmatprep.subr.bf16.mxu1 %v2902_v29 }
 0x118   : > { %2596 = vmatprep.subr.bf16.mxu0 %v2903_v32 }
 0x119   : > { %2357 = vmatmul.mubr.msk.bf16.gmra.mrb[24].mxu1 %vm3384_vm11, %v3274_v15  ;;  %2393 = vmatmul.mubr.msk.bf16.gmra.mrb[24].mxu0 %vm3384_vm11, %v3274_v15  ;;  %v2909_v15 = vld [vmem:[%s3590_s3 + $0x130] sm:$0xff]  }
 0x11a   : > { %2700 = vmatpush3.bf16.msra.mxu1 %v2902_v29  ;;  %1165 = vmatprep.mubr.bf16.mxu1 %v3176_v30 }
 0x11b   : > { %1487 = vmatprep.mubr.bf16.mxu0 %v3176_v30  ;;  %2597 = vmatpush3.bf16.msra.mxu0 %v2904_v62 }
 0x11c   : > { %2701 = vmatprep.subr.bf16.mxu1 %v2905_v20  ;;  %2598 = vmatprep.subr.bf16.mxu0 %v2906_v14 }
 0x11e   : > { %2702 = vmatpush3.bf16.msra.mxu1 %v2905_v20 }
 0x11f   : > { %2599 = vmatpush3.bf16.msra.mxu0 %v2907_v19  ;;  %2703 = vmatprep.subr.bf16.mxu1 %v2908_v21 }
 0x120   : > { %2600 = vmatprep.subr.bf16.mxu0 %v2909_v15 }
 0x121   : > { %2360 = vmatmul.mubr.msk.bf16.gmra.mrb[28].mxu1 %vm3414_vm14, %v3301_v26  ;;  %2396 = vmatmul.mubr.msk.bf16.gmra.mrb[28].mxu0 %vm3414_vm14, %v3301_v26  ;;  %v2915_v26 = vld [vmem:[%s3590_s3 + $0x88] sm:$0xff]  }
 0x122   : > { %2704 = vmatpush3.bf16.msra.mxu1 %v2908_v21  ;;  %2707 = vmatprep.mubr.bf16.mxu1 %v3210_v9 }
 0x123   : > { %2601 = vmatpush3.bf16.msra.mxu0 %v2910_v22  ;;  %2705 = vmatprep.subr.bf16.mxu1 %v2911_v23 }
 0x124   : > { %2602 = vmatprep.subr.bf16.mxu0 %v2912_v24  ;;  %1737 = vmatprep.mubr.bf16.mxu0 %v3182_v34  ;;  %v2916_v34 = vld [vmem:[%s3590_s3 + $0x90] sm:$0xff]  }
 0x126   : > { %2706 = vmatpush3.bf16.msra.mxu1 %v2911_v23 }
 0x127   : > { %2603 = vmatpush3.bf16.msra.mxu0 %v2913_v25  ;;  %2715 = vmatprep.subr.bf16.mxu1 %v2914_v27 }
 0x128   : > { %2833 = vmatprep.subr.msk.bf16.mxu0 %vm476_vm0, %v1894_v50 }
 0x129   : > { %2708 = vmatmul.mubr.bf16.vlgmr.msra.gmra.mrb[32].mxu1 %v3206_v5 }
 0x12a   : > { %2716 = vmatpush3.bf16.msra.mxu1 %v2914_v27  ;;  %2423 = vmatmul.mubr.msk.bf16.vlgmr.msra.gmra.mrb[32].mxu0 %vm3251_vm6, %v2422_v58 }
 0x12b   : > { %2711 = vmatprep.mubr.bf16.mxu1 %v3241_v57  ;;  %2717 = vmatprep.subr.bf16.mxu1 %v2915_v26 }
 0x12c   : > { %1745 = vmatprep.mubr.bf16.mxu0 %v3178_v31  ;;  %v2918_v31 = vld [vmem:[%s3590_s3 + $0xa0] sm:$0xff]   ;;  %2764 = vmatpush3.bf16.msra.mxu0 %v1896_v35 }
 0x12d   : > { %2773 = vmatprep.subr.bf16.mxu0 %v2930_v38 }
 0x12e   : > { %2718 = vmatpush3.bf16.msra.mxu1 %v2915_v26 }
 0x12f   : > { %2719 = vmatprep.subr.bf16.mxu1 %v2916_v34 }
 0x131   : > { %2712 = vmatmul.mubr.bf16.gmra.mrb[36].mxu1 %v3235_v51 }
 0x132   : > { %2720 = vmatpush3.bf16.msra.mxu1 %v2916_v34  ;;  %2426 = vmatmul.mubr.msk.bf16.gmra.mrb[36].mxu0 %vm3323_vm8, %v2425_v28  ;;  %v2925_v28 = vld [vmem:[%s3590_s3 + $0x158] sm:$0xff]  }
 0x133   : > { %2731 = vmatprep.mubr.bf16.mxu1 %v3210_v9  ;;  %2721 = vmatprep.subr.bf16.mxu1 %v2917_v33  ;;  %v2920_v9 = vld [vmem:[%s3590_s3 + $0xb0] sm:$0xff]  }
 0x134   : > { %1753 = vmatprep.mubr.bf16.mxu0 %v3212_v11  ;;  %v2921_v11 = vld [vmem:[%s3590_s3 + $0xb8] sm:$0xff]  }
 0x136   : > { %2722 = vmatpush3.bf16.msra.mxu1 %v2917_v33 }
 0x137   : > { %2723 = vmatprep.subr.bf16.mxu1 %v2918_v31 }
 0x13a   : > { %2724 = vmatpush3.bf16.msra.mxu1 %v2918_v31  ;;  %2429 = vmatmul.mubr.msk.bf16.gmra.mrb[40].mxu0 %vm3384_vm11, %v2428_v61 }
 0x13b   : > { %2725 = vmatprep.subr.bf16.mxu1 %v2919_v0  ;;  %1761 = vmatprep.mubr.bf16.mxu0 %v3208_v6  ;;  %v2923_v6 = vld [vmem:[%s3590_s3 + $0x148] sm:$0xff]  }
 0x13e   : > { %2726 = vmatpush3.bf16.msra.mxu1 %v2919_v0 }
 0x13f   : > { %2727 = vmatprep.subr.bf16.mxu1 %v2920_v9 }
 0x142   : > { %2728 = vmatpush3.bf16.msra.mxu1 %v2920_v9  ;;  %2432 = vmatmul.mubr.msk.bf16.gmra.mrb[44].mxu0 %vm3414_vm14, %v2431_v3 }
 0x143   : > { %2729 = vmatprep.subr.bf16.mxu1 %v2921_v11  ;;  %2765 = vmatprep.mubr.msk.bf16.mxu0 %vm427_vm1, %v2938_v16 }
 0x146   : > { %2730 = vmatpush3.bf16.msra.mxu1 %v2921_v11 }
 0x147   : > { %2739 = vmatprep.subr.bf16.mxu1 %v2922_v63 }
 0x149   : > { %2732 = vmatmul.mubr.bf16.vlgmr.msra.gmra.mrb[40].mxu1 %v3206_v5  ;;  %v2926_v5 = vld [vmem:[%s3590_s3 + $0x160] sm:$0xff]  }
 0x14a   : > { %2735 = vmatprep.mubr.bf16.mxu1 %v3241_v57  ;;  %2740 = vmatpush3.bf16.msra.mxu1 %v2922_v63  ;;  %v2927_v57 = vld [vmem:[%s3590_s3 + $0x168] sm:$0xff]  }
 0x14b   : > { %2741 = vmatprep.subr.bf16.mxu1 %v2923_v6  ;;  %2766 = vmatmul.mubr.msk.bf16.vlgmr.msra.gmra.mrb[48].mxu0 %vm427_vm1, %v2939_v36 }
 0x14c   : > { %2769 = vmatprep.mubr.msk.bf16.mxu0 %vm427_vm1, %v2940_v37  ;;  %2774 = vmatpush3.bf16.msra.mxu0 %v2930_v38 }
 0x14d   : > { %2775 = vmatprep.subr.bf16.mxu0 %v2931_v52 }
 0x14e   : > { %2742 = vmatpush3.bf16.msra.mxu1 %v2923_v6 }
 0x14f   : > { %2743 = vmatprep.subr.bf16.mxu1 %v2924_v17 }
 0x150   : > { %2776 = vmatpush3.bf16.msra.mxu0 %v2931_v52 }
 0x151   : > { %2736 = vmatmul.mubr.bf16.gmra.mrb[44].mxu1 %v3235_v51  ;;  %v2928_v51 = vld [vmem:[%s3590_s3 + $0x170] sm:$0xff]   ;;  %2777 = vmatprep.subr.bf16.mxu0 %v2932_v1 }
 0x152   : > { %2744 = vmatpush3.bf16.msra.mxu1 %v2924_v17  ;;  %2755 = vmatprep.mubr.bf16.mxu1 %v3285_v18  ;;  %v2929_v18 = vld [vmem:[%s3590_s3 + $0x178] sm:$0xff]  }
 0x153   : > { %2745 = vmatprep.subr.bf16.mxu1 %v2925_v28 }
 0x154   : > { %2778 = vmatpush3.bf16.msra.mxu0 %v2932_v1 }
 0x155   : > { %2779 = vmatprep.subr.bf16.mxu0 %v2933_v39 }
 0x156   : > { %2746 = vmatpush3.bf16.msra.mxu1 %v2925_v28 }
 0x157   : > { %2747 = vmatprep.subr.bf16.mxu1 %v2926_v5 }
 0x158   : > { %2780 = vmatpush3.bf16.msra.mxu0 %v2933_v39 }
 0x159   : > { %2781 = vmatprep.subr.bf16.mxu0 %v2934_v40 }
 0x15a   : > { %2748 = vmatpush3.bf16.msra.mxu1 %v2926_v5 }
 0x15b   : > { %2749 = vmatprep.subr.bf16.mxu1 %v2927_v57 }
 0x15c   : > { %2782 = vmatpush3.bf16.msra.mxu0 %v2934_v40 }
 0x15d   : > { %2783 = vmatprep.subr.bf16.mxu0 %v2935_v41 }
 0x15e   : > { %2750 = vmatpush3.bf16.msra.mxu1 %v2927_v57 }
 0x15f   : > { %2751 = vmatprep.subr.bf16.mxu1 %v2928_v51 }
 0x160   : > { %2784 = vmatpush3.bf16.msra.mxu0 %v2935_v41 }
 0x162   : > { %2752 = vmatpush3.bf16.msra.mxu1 %v2928_v51 }
 0x163   : > { %2753 = vmatprep.subr.bf16.mxu1 %v2929_v18 }
 0x166   : > { %2754 = vmatpush3.bf16.msra.mxu1 %v2929_v18 }
 0x169   : > { %2756 = vmatmul.mubr.bf16.vlgmr.msra.gmra.mrb[32].mxu1 %v3255_v2  ;;  %v2941_v2 = vld [vmem:[%s3015_s12 + $0x18] sm:$0xff]  }
 0x16a   : > { %2759 = vmatprep.mubr.bf16.mxu1 %v3327_v47  ;;  %2770 = vmatmul.mubr.msk.bf16.gmra.mrb[52].mxu0 %vm427_vm1, %v2941_v2 }
 0x171   : > { %2760 = vmatmul.mubr.bf16.gmra.mrb[36].mxu1 %v3317_v42  ;;  %v2936_v42 = vld [vmem:[%s3592_s5 + $0x30] sm:$0xff]  }
 0x172   : > { %2785 = vmatprep.subr.bf16.mxu0 %v2936_v42 }
 0x173   : > { %2786 = vmatpush3.bf16.msra.mxu0 %v2936_v42 }
 0x174   : > { %2787 = vmatprep.subr.bf16.mxu0 %v2937_v43 }
 0x177   : > { %2788 = vmatpush3.bf16.msra.mxu0 %v2937_v43 }
 0x1dc   : > { %v2500_v44 = vpop.f32.mrb[16].mxu1  ;;  %v2552_v45 = vpop.f32.mrb[16].mxu0 }
 0x1dd   : > { %v2501_v47 = vpop.f32.mrb[17].mxu1  ;;  %v2553_v48 = vpop.f32.mrb[17].mxu0 }
 0x1de   : > { %v2502_v49 = vadd.f32 %v2501_v47, %v2500_v44  ;;  %v3557_v46 = vadd.f32 %v2553_v48, %v2552_v45  ;;  %v2503_v54 = vpop.f32.mrb[18].mxu1  ;;  %v2555_v55 = vpop.f32.mrb[18].mxu0 }
 0x1df   : > { %v2504_v56 = vpop.f32.mrb[19].mxu1  ;;  %v2556_v59 = vpop.f32.mrb[19].mxu0 }
 0x1e0   : > { %v2505_v58 = vadd.f32 %v2504_v56, %v2503_v54  ;;  %v3559_v60 = vadd.f32 %v2556_v59, %v2555_v55 }
 0x1e4   : > { %v2506_v53 = vpop.f32.mrb[20].mxu1  ;;  %v2558_v61 = vpop.f32.mrb[20].mxu0 }
 0x1e5   : > { %v2507_v3 = vpop.f32.mrb[21].mxu1  ;;  %v2559_v4 = vpop.f32.mrb[21].mxu0 }
 0x1e6   : > { %v2508_v29 = vadd.f32 %v2507_v3, %v2506_v53  ;;  %v3561_v8 = vadd.f32 %v2559_v4, %v2558_v61  ;;  %v2509_v10 = vpop.f32.mrb[22].mxu1  ;;  %v2561_v32 = vpop.f32.mrb[22].mxu0 }
 0x1e7   : > { %v2510_v12 = vpop.f32.mrb[23].mxu1  ;;  %v2562_v62 = vpop.f32.mrb[23].mxu0 }
 0x1e8   : > { %v2511_v7 = vadd.f32 %v2510_v12, %v2509_v10  ;;  %v2563_v13 = vadd.f32 %v2562_v62, %v2561_v32 }
 0x1ec   : > { %v2512_v20 = vpop.f32.mrb[24].mxu1  ;;  %v2564_v14 = vpop.f32.mrb[24].mxu0 }
 0x1ed   : > { %v2513_v19 = vpop.f32.mrb[25].mxu1  ;;  %v2565_v21 = vpop.f32.mrb[25].mxu0 }
 0x1ee   : > { %v2514_v15 = vadd.f32 %v2513_v19, %v2512_v20  ;;  %v2566_v30 = vadd.f32 %v2565_v21, %v2564_v14  ;;  %v2515_v22 = vpop.f32.mrb[26].mxu1  ;;  %v2567_v23 = vpop.f32.mrb[26].mxu0 }
 0x1ef   : > { %v2516_v24 = vpop.f32.mrb[27].mxu1  ;;  %v2568_v25 = vpop.f32.mrb[27].mxu0 }
 0x1f0   : > { %v2517_v27 = vadd.f32 %v2516_v24, %v2515_v22  ;;  %v2569_v26 = vadd.f32 %v2568_v25, %v2567_v23 }
 0x1f4   : > { %v2518_v34 = vpop.f32.mrb[28].mxu1  ;;  %v2570_v33 = vpop.f32.mrb[28].mxu0 }
 0x1f5   : > { %v2519_v31 = vpop.f32.mrb[29].mxu1  ;;  %v2571_v0 = vpop.f32.mrb[29].mxu0 }
 0x1f6   : > { %v2520_v9 = vadd.f32 %v2519_v31, %v2518_v34  ;;  %v2572_v11 = vadd.f32 %v2571_v0, %v2570_v33  ;;  %v2521_v63 = vpop.f32.mrb[30].mxu1  ;;  %v2573_v16 = vpop.f32.mrb[30].mxu0 }
 0x1f7   : > { %v2522_v6 = vpop.f32.mrb[31].mxu1  ;;  %v2574_v17 = vpop.f32.mrb[31].mxu0 }
 0x1f8   : > { %v2523_v28 = vadd.f32 %v2522_v6, %v2521_v63 }
 0x1fd   : > { %v2604_v5 = vpop.f32.mrb[32].mxu0 }
 0x1fe   : > { %v2605_v57 = vpop.f32.mrb[33].mxu0 }
 0x1ff   : > { %v2606_v51 = vadd.f32 %v2605_v57, %v2604_v5  ;;  %v2607_v18 = vpop.f32.mrb[34].mxu0 }
 0x200   : > { %v2608_v50 = vpop.f32.mrb[35].mxu0 }
 0x201   : > { %v2609_v35 = vadd.f32 %v2608_v50, %v2607_v18  ;;  %v2801_v36 = vadd.f32 %v2606_v51, %v2502_v49 }
 0x203   : > { %v2805_v37 = vadd.f32 %v2609_v35, %v2505_v58 }
 0x205   : > { %v2610_v2 = vpop.f32.mrb[36].mxu0 }
 0x206   : > { %v2611_v38 = vpop.f32.mrb[37].mxu0 }
 0x207   : > { %v2612_v52 = vadd.f32 %v2611_v38, %v2610_v2  ;;  %v2613_v1 = vpop.f32.mrb[38].mxu0 }
 0x208   : > { %v2614_v39 = vpop.f32.mrb[39].mxu0 }
 0x209   : > { %v2615_v40 = vadd.f32 %v2614_v39, %v2613_v1  ;;  %v2799_v41 = vadd.f32 %v2612_v52, %v2508_v29 }
 0x20b   : > { %v2803_v42 = vadd.f32 %v2615_v40, %v2511_v7 }
 0x20d   : > { %v2616_v43 = vpop.f32.mrb[40].mxu0 }
 0x20e   : > { %v2617_v44 = vpop.f32.mrb[41].mxu0 }
 0x20f   : > { %v2618_v45 = vadd.f32 %v2617_v44, %v2616_v43  ;;  %v2619_v47 = vpop.f32.mrb[42].mxu0 }
 0x210   : > { %v2620_v48 = vpop.f32.mrb[43].mxu0 }
 0x211   : > { %v2621_v54 = vadd.f32 %v2620_v48, %v2619_v47  ;;  %v2809_v55 = vadd.f32 %v2618_v45, %v2514_v15 }
 0x213   : > { %v2813_v56 = vadd.f32 %v2621_v54, %v2517_v27 }
 0x215   : > { %v2622_v59 = vpop.f32.mrb[44].mxu0 }
 0x216   : > { %v2623_v53 = vpop.f32.mrb[45].mxu0 }
 0x217   : > { %v2624_v49 = vadd.f32 %v2623_v53, %v2622_v59  ;;  %v2625_v58 = vpop.f32.mrb[46].mxu0 }
 0x218   : > { %v2626_v61 = vpop.f32.mrb[47].mxu0 }
 0x219   : > { %v2627_v3 = vadd.f32 %v2626_v61, %v2625_v58  ;;  %v2807_v4 = vadd.f32 %v2624_v49, %v2520_v9 }
 0x21b   : > { %v2811_v10 = vadd.f32 %v2627_v3, %v2523_v28 }
 0x21c   : > { %v2733_v32 = vpop.f32.mrb[40].mxu1 }
 0x21d   : > { %v1539_v29 = vadd.f32 %v2733_v32, %v3561_v8  ;;  %v1530_v12 = vpop.f32.mrb[41].mxu1  ;;  %v2433_v8 = vld [vmem:[%s3591_s4] ss:$0 sm:$0xff] }
 0x21e   : > { %v1531_v62 = vadd.f32 %v3557_v46, %v1530_v12  ;;  %v2734_v7 = vpop.f32.mrb[42].mxu1 }
 0x21f   : > { %v1542_v20 = vadd.f32 %v2734_v7, %v2563_v13  ;;  %v1533_v14 = vpop.f32.mrb[43].mxu1 }
 0x220   : > { %v1534_v19 = vadd.f32 %v3559_v60, %v1533_v14 }
 0x224   : > { %v2737_v21 = vpop.f32.mrb[44].mxu1 }
 0x225   : > { %v1555_v15 = vadd.f32 %v2737_v21, %v2572_v11  ;;  %v1546_v22 = vpop.f32.mrb[45].mxu1 }
 0x226   : > { %v1547_v23 = vadd.f32 %v2566_v30, %v1546_v22  ;;  %v2738_v24 = vpop.f32.mrb[46].mxu1 }
 0x227   : > { %v1549_v25 = vpop.f32.mrb[47].mxu1 }
 0x228   : > { %v1550_v27 = vadd.f32 %v2569_v26, %v1549_v25 }
 0x23c   : > { %v2757_v34 = vpop.f32.mrb[32].mxu1 }
 0x23d   : > { %v2800_v33 = vadd.f32 %v2799_v41, %v2757_v34  ;;  %v1804_v31 = vpop.f32.mrb[33].mxu1 }
 0x23e   : > { %v2802_v46 = vadd.f32 %v2801_v36, %v1804_v31  ;;  %v2758_v0 = vpop.f32.mrb[34].mxu1 }
 0x23f   : > { %v1845_v13 = vadd.f32 %v2800_v33, %v1534_v19  ;;  %v2804_v9 = vadd.f32 %v2803_v42, %v2758_v0  ;;  %v1807_v63 = vpop.f32.mrb[35].mxu1 }
 0x240   : > { %v2806_v60 = vadd.f32 %v2805_v37, %v1807_v63  ;;  %v1858_v6 = vadd.f32 %v2802_v46, %v2433_v8 }
 0x241   : > { %v1860_v16 = vadd.f32 %v2433_v8, %v1845_v13  ;;  %v1846_v11 = vadd.f32 %v2804_v9, %v1539_v29 }
 0x242   : > { %v1844_v30 = vadd.f32 %v2806_v60, %v1531_v62  ;;  %v1866_v50 = vmax.f32 %v1858_v6, 0.0 }
 0x243   : > { %v1861_v17 = vadd.f32 %v2433_v8, %v1846_v11  ;;  %v1868_v5 = vmax.f32 %v1860_v16, 0.0 }
 0x244   : > { %v1859_v28 = vadd.f32 %v2433_v8, %v1844_v30  ;;  %v2761_v26 = vpop.f32.mrb[36].mxu1 }
 0x245   : > { %v1869_v57 = vmax.f32 %v1861_v17, 0.0  ;;  %v2808_v51 = vadd.f32 %v2807_v4, %v2761_v26  ;;  %v1820_v18 = vpop.f32.mrb[37].mxu1 }
 0x246   : > { %v1867_v35 = vmax.f32 %v1859_v28, 0.0  ;;  %v2810_v2 = vadd.f32 %v2809_v55, %v1820_v18  ;;  %v2762_v36 = vpop.f32.mrb[38].mxu1 }
 0x247   : > { %v1875_v38 = vpack.c.bf16 %v1869_v57, %v1868_v5  ;;  %v1849_v52 = vadd.f32 %v2808_v51, %v1550_v27  ;;  %v2812_v1 = vadd.f32 %v2811_v10, %v2762_v36  ;;  %v1823_v39 = vpop.f32.mrb[39].mxu1 }
 0x248   : > { %v1847_v37 = vadd.f32 %v2810_v2, %v1542_v20  ;;  %v2814_v40 = vadd.f32 %v2813_v56, %v1823_v39  ;;  %v1874_v41 = vpack.c.bf16 %v1867_v35, %v1866_v50  ;;  %v2446_v56 = vld [vmem:[%s3594_s7] ss:$0 sm:$0xff] }
 0x249   : > { %v1864_v42 = vadd.f32 %v2433_v8, %v1849_v52  ;;  %v1850_v43 = vadd.f32 %v2812_v1, %v1555_v15 }
 0x24a   : > { %v1862_v44 = vadd.f32 %v2433_v8, %v1847_v37  ;;  %v1848_v45 = vadd.f32 %v2814_v40, %v1547_v23  ;;  %2789 = vmatprep.mubr.bf16.mxu0 %v1874_v41 }
 0x24b   : > { %v1865_v47 = vadd.f32 %v2433_v8, %v1850_v43  ;;  %2790 = vmatmul.mubr.bf16.vlgmr.msra.gmra.mrb[48].mxu0 %v1875_v38  ;;  %v1872_v54 = vmax.f32 %v1864_v42, 0.0 }
 0x24c   : > { %v1863_v48 = vadd.f32 %v2433_v8, %v1848_v45  ;;  %v1870_v55 = vmax.f32 %v1862_v44, 0.0 }
 0x24d   : > { %v1873_v59 = vmax.f32 %v1865_v47, 0.0 }
 0x24e   : > { %v1871_v53 = vmax.f32 %v1863_v48, 0.0 }
 0x24f   : > { %v1877_v49 = vpack.c.bf16 %v1873_v59, %v1872_v54 }
 0x250   : > { %v1876_v58 = vpack.c.bf16 %v1871_v53, %v1870_v55 }
 0x252   : > { %2793 = vmatprep.mubr.bf16.mxu0 %v1876_v58 }
 0x253   : > { %2794 = vmatmul.mubr.bf16.gmra.mrb[52].mxu0 %v1877_v49 }
 0x31e   : > { %v2791_v61 = vpop.f32.mrb[48].mxu0 }
 0x31f   : > { %v2085_v3 = vadd.f32 %v2791_v61, %v2446_v56  ;;  %v2045_v4 = vpop.f32.mrb[49].mxu0 }
 0x320   : > { %v2083_v10 = vadd.f32 %v2446_v56, %v2045_v4  ;;  %v2792_v32 = vpop.f32.mrb[50].mxu0 }
 0x321   : > { %v2461_v29 = vpack.c.bf16 %v2085_v3, %v2085_v3  ;;  %v2086_v12 = vadd.f32 %v2792_v32, %v2446_v56  ;;  %v2048_v62 = vpop.f32.mrb[51].mxu0 }
 0x322   : > { %v2459_v7 = vpack.c.bf16 %v2083_v10, %v2083_v10  ;;  %v2084_v20 = vadd.f32 %v2446_v56, %v2048_v62 }
 0x323   : > { %2126 = vst.msk [vmem:[%s305_s11 + $0x8] sm:$0xf] %vm2123_vm15, %v2461_v29  ;;  %v2462_v14 = vpack.c.bf16 %v2086_v12, %v2086_v12 }
 0x324   : > { %2124 = vst.msk [vmem:[%s305_s11] sm:$0xf] %vm2123_vm15, %v2459_v7  ;;  %v2460_v19 = vpack.c.bf16 %v2084_v20, %v2084_v20 }
 0x325   : > { %2127 = vst.msk [vmem:[%s305_s11 + $0xc] sm:$0xf] %vm2123_vm15, %v2462_v14 }
 0x326   : > { %2125 = vst.msk [vmem:[%s305_s11 + $0x4] sm:$0xf] %vm2123_vm15, %v2460_v19  ;;  %v2795_v21 = vpop.f32.mrb[52].mxu0 }
 0x327   : > { %v2089_v15 = vadd.f32 %v2795_v21, %v2446_v56  ;;  %v2061_v22 = vpop.f32.mrb[53].mxu0 }
 0x328   : > { %v2087_v23 = vadd.f32 %v2446_v56, %v2061_v22  ;;  %v2796_v24 = vpop.f32.mrb[54].mxu0 }
 0x329   : > { %v2465_v25 = vpack.c.bf16 %v2089_v15, %v2089_v15  ;;  %v2090_v27 = vadd.f32 %v2796_v24, %v2446_v56  ;;  %v2064_v34 = vpop.f32.mrb[55].mxu0 }
 0x32a   : > { %v2463_v33 = vpack.c.bf16 %v2087_v23, %v2087_v23  ;;  %v2088_v31 = vadd.f32 %v2446_v56, %v2064_v34 }
 0x32b   : > { %2130 = vst.msk [vmem:[%s305_s11 + $0x18] sm:$0xf] %vm2123_vm15, %v2465_v25  ;;  %v2466_v8 = vpack.c.bf16 %v2090_v27, %v2090_v27 }
 0x32c   : > { %2128 = vst.msk [vmem:[%s305_s11 + $0x10] sm:$0xf] %vm2123_vm15, %v2463_v33  ;;  %v2464_v46 = vpack.c.bf16 %v2088_v31, %v2088_v31 }
 0x32d   : > { %2131 = vst.msk [vmem:[%s305_s11 + $0x1c] sm:$0xf] %vm2123_vm15, %v2466_v8 }
 0x32e   : > { %2129 = vst.msk [vmem:[%s305_s11 + $0x14] sm:$0xf] %vm2123_vm15, %v2464_v46 }
 0x32f PF: > { %s18_s27 = sadd.s32 1, %s2948_s27  }
 0x330   : > { %p15_p4 = scmp.ge.s32.totalorder %s18_s27, 4  }
 0x332   :  { %17 = sbr.rel (!%p15_p4) target bundleno = 1 (0x1), region = 84 }

</bundles_post_ra>
